<compile_context>
chip_gen: v7x
topology: tpu7x:2x2x1
jax: 0.10.0
libtpu: 0.0.40
codegen_flags: <defaults>
</compile_context>

<pallas_src>
import functools

import jax
import jax.numpy as jnp
from jax.experimental import pallas as pl
from jax.experimental.pallas import tpu as pltpu


# -----------------------------------------------------------------------------
# Kernel: one batch tile -> logits = x @ W_total + b_total -> softmax.
# -----------------------------------------------------------------------------
def _actor_kernel(x_ref, w_ref, b_ref, o_ref):
    # x_ref: (TB, D_in) f32, w_ref: (D_in, NPAD) f32, b_ref: (1, NPAD) f32.
    logits = jnp.dot(x_ref[...], w_ref[...],
                     preferred_element_type=jnp.float32) + b_ref[...]
    # Padded columns carry bias -1e30 -> exp underflows to exactly 0, so the
    # lane-dense 128-wide softmax equals the softmax over the real n_actions.
    m = jnp.max(logits, axis=1, keepdims=True)
    e = jnp.exp(logits - m)
    s = jnp.sum(e, axis=1, keepdims=True)
    o_ref[...] = (e / s).astype(o_ref.dtype)          # exact normalization


# -----------------------------------------------------------------------------
# Wrapper: batch-tiled grid, weights VMEM-resident via constant index_map.
# -----------------------------------------------------------------------------
def actor_forward(state_nchw, w_total, b_total, *, n_actions, block_b=8):
    B = state_nchw.shape[0]
    d_in, n_pad = w_total.shape

    # PyTorch flattens (C,H,W) row-major; the host fold used the same order.
    x = state_nchw.reshape(B, d_in).astype(jnp.float32)

    # Pad the batch to a multiple of the tile (8 = f32 sublane width).
    bp = ((B + block_b - 1) // block_b) * block_b
    if bp != B:
        x = jnp.pad(x, ((0, bp - B), (0, 0)))

    out = pl.pallas_call(
        _actor_kernel,
        out_shape=jax.ShapeDtypeStruct((bp, n_pad), jnp.float32),
        grid_spec=pltpu.PrefetchScalarGridSpec(
            num_scalar_prefetch=0,
            grid=(bp // block_b,),
            in_specs=[
                pl.BlockSpec((block_b, d_in), lambda i: (i, 0)),   # batch tile
                pl.BlockSpec((d_in, n_pad), lambda i: (0, 0)),     # weight (resident)
                pl.BlockSpec((1, n_pad), lambda i: (0, 0)),        # bias   (resident)
            ],
            out_specs=pl.BlockSpec((block_b, n_pad), lambda i: (i, 0)),
        ),
        compiler_params=pltpu.CompilerParams(
            dimension_semantics=("parallel",)),     # v7x: both TCs split the batch
    )(x, w_total, b_total)

    # Kernel store is lane-dense (.., 128); slice the real action columns here.
    return out[:B, :n_actions]


# -----------------------------------------------------------------------------
# Parameters: master copy in PyTorch layout (OIHW conv, (out,in) Linear).
# -----------------------------------------------------------------------------
def init_params(key, input_dims, fc1_dims, fc2_dims, n_actions):
    C, H, W = input_dims
    conv_out = (H - 4) * (W - 4) * 64
    ks = jax.random.split(key, 10)
    s = 0.05
    return {
        "w_conv1": s * jax.random.normal(ks[0], (32, C, 3, 3), jnp.float32),   # OIHW
        "b_conv1": s * jax.random.normal(ks[1], (32,), jnp.float32),
        "w_conv2": s * jax.random.normal(ks[2], (64, 32, 3, 3), jnp.float32),  # OIHW
        "b_conv2": s * jax.random.normal(ks[3], (64,), jnp.float32),
        "w_fc1": s * jax.random.normal(ks[4], (fc1_dims, conv_out), jnp.float32),
        "b_fc1": s * jax.random.normal(ks[5], (fc1_dims,), jnp.float32),
        "w_fc2": s * jax.random.normal(ks[6], (fc2_dims, fc1_dims), jnp.float32),
        "b_fc2": s * jax.random.normal(ks[7], (fc2_dims,), jnp.float32),
        "w_pi": s * jax.random.normal(ks[8], (n_actions, fc2_dims), jnp.float32),
        "b_pi": s * jax.random.normal(ks[9], (n_actions,), jnp.float32),
    }


def _logits_reference(state_nchw, params):
    """Step-by-step f32 logits with exact PyTorch semantics (NCHW conv / flatten)."""
    dn = ("NCHW", "OIHW", "NCHW")
    x1 = jax.lax.conv_general_dilated(state_nchw, params["w_conv1"], (1, 1), "VALID",
                                      dimension_numbers=dn)
    x1 = x1 + params["b_conv1"][None, :, None, None]
    x2 = jax.lax.conv_general_dilated(x1, params["w_conv2"], (1, 1), "VALID",
                                      dimension_numbers=dn)
    x2 = x2 + params["b_conv2"][None, :, None, None]
    x3 = x2.reshape(x2.shape[0], -1)
    h1 = x3 @ params["w_fc1"].T + params["b_fc1"]
    h2 = h1 @ params["w_fc2"].T + params["b_fc2"]
    return h2 @ params["w_pi"].T + params["b_pi"]


def reference_forward(state_nchw, params):
    return jax.nn.softmax(_logits_reference(state_nchw, params), axis=1)


def prepare_kernel_params(params, input_dims, n_actions, *, n_pad=128):
    """One-time host-side constant fold of the ENTIRE (activation-free) network.

    logits(x) is affine in the flattened input, so
        b_total      = logits(0)
        W_total[i,:] = logits(e_i) - logits(0)
    computed in f32 by pushing the canonical basis through the reference forward.
    The output columns are zero-padded to n_pad=128 (padded bias = -1e30) so the
    kernel's matmul / softmax / store are lane-dense.
    """
    C, H, W = input_dims
    d_in = C * H * W
    basis = jnp.concatenate(
        [jnp.zeros((1, d_in), jnp.float32), jnp.eye(d_in, dtype=jnp.float32)], axis=0
    ).reshape(d_in + 1, C, H, W)
    logits = _logits_reference(basis, params)             # (d_in + 1, n_actions) f32
    b_total = logits[0]                                    # f(0)
    w_total = logits[1:] - b_total[None, :]                # f(e_i) - f(0)

    n_pad = max(n_pad, n_actions)
    w_pad = jnp.zeros((d_in, n_pad), jnp.float32).at[:, :n_actions].set(w_total)
    b_pad = jnp.full((1, n_pad), -1e30, jnp.float32).at[0, :n_actions].set(b_total)
    return {"w_total": w_pad, "b_total": b_pad}


if __name__ == "__main__":
    key = jax.random.PRNGKey(0)
    k_param, k_state = jax.random.split(key)

    C, H, W = 1, 16, 16                       # input_dims = (1, 16, 16)
    fc1_dims, fc2_dims, n_actions = 64, 32, 6
    B = 16                                    # two batch tiles of 8 -> grid = (2,)

    params = init_params(k_param, (C, H, W), fc1_dims, fc2_dims, n_actions)
    kparams = prepare_kernel_params(params, (C, H, W), n_actions)
    state = jax.random.normal(k_state, (B, C, H, W), jnp.float32)

    fwd = jax.jit(functools.partial(actor_forward, n_actions=n_actions))
    probs = fwd(state, kparams["w_total"], kparams["b_total"])
    probs = jax.block_until_ready(probs)

    ref = reference_forward(state, params)
    assert probs.shape == (B, n_actions)
    max_diff = jnp.max(jnp.abs(probs - ref))
    assert jnp.allclose(probs, ref, rtol=2e-2, atol=2e-3), f"max abs diff {max_diff}"
    assert jnp.allclose(jnp.sum(probs, axis=1), 1.0, atol=1e-5)

    print("KERNEL_OK")
</pallas_src>

<mosaic_0001>
module attributes {stable_mosaic.version = 11 : i64} {
  func.func @_actor_kernel(%arg0: i32, %arg1: memref<8x256xf32, #tpu.memory_space<vmem>>, %arg2: memref<256x128xf32, #tpu.memory_space<vmem>>, %arg3: memref<1x128xf32, #tpu.memory_space<vmem>>, %arg4: memref<8x128xf32, #tpu.memory_space<vmem>>) attributes {dimension_semantics = [#tpu.dimension_semantics<parallel>], iteration_bounds = array<i64: 2>, scalar_prefetch = 0 : i64, scratch_operands = 0 : i64, tpu.core_type = #tpu.core_type<tc>, window_params = [{transform_indices = @transform_0, window_bounds = array<i64: 8, 256>}, {pipeline_mode = #tpu.pipeline_mode<synchronous>, transform_indices = @transform_1, window_bounds = array<i64: 256, 128>}, {pipeline_mode = #tpu.pipeline_mode<synchronous>, transform_indices = @transform_2, window_bounds = array<i64: 1, 128>}, {transform_indices = @transform_3, window_bounds = array<i64: 8, 128>}]} {
    %c0 = arith.constant 0 : index
    %c0_0 = arith.constant 0 : index
    %0 = vector.load %arg1[%c0, %c0_0] : memref<8x256xf32, #tpu.memory_space<vmem>>, vector<8x256xf32>
    %c0_1 = arith.constant 0 : index
    %c0_2 = arith.constant 0 : index
    %1 = vector.load %arg2[%c0_1, %c0_2] : memref<256x128xf32, #tpu.memory_space<vmem>>, vector<256x128xf32>
    %cst = arith.constant dense<0.000000e+00> : vector<8x128xf32>
    %2 = tpu.matmul %0, %1, %cst {dimension_numbers = #tpu.dot_dimension_numbers<[1], [0], [0], [1], [0, 0, 1, 1], [], []>} : vector<8x256xf32>, vector<256x128xf32>, vector<8x128xf32> -> vector<8x128xf32>
    %c0_3 = arith.constant 0 : index
    %c0_4 = arith.constant 0 : index
    %3 = vector.load %arg3[%c0_3, %c0_4] : memref<1x128xf32, #tpu.memory_space<vmem>>, vector<1x128xf32>
    %4 = vector.broadcast %3 : vector<1x128xf32> to vector<8x128xf32>
    %5 = arith.addf %2, %4 : vector<8x128xf32>
    %cst_5 = arith.constant dense<0xFF800000> : vector<8xf32>
    %6 = vector.multi_reduction <maximumf>, %5, %cst_5 [1] : vector<8x128xf32> to vector<8xf32>
    %7 = vector.shape_cast %6 : vector<8xf32> to vector<8x1xf32>
    %8 = vector.broadcast %7 : vector<8x1xf32> to vector<8x128xf32>
    %9 = arith.subf %5, %8 : vector<8x128xf32>
    %10 = math.exp %9 : vector<8x128xf32>
    %cst_6 = arith.constant dense<0.000000e+00> : vector<8xf32>
    %11 = vector.multi_reduction <add>, %10, %cst_6 [1] : vector<8x128xf32> to vector<8xf32>
    %12 = vector.shape_cast %11 : vector<8xf32> to vector<8x1xf32>
    %13 = vector.broadcast %12 : vector<8x1xf32> to vector<8x128xf32>
    %14 = arith.divf %10, %13 : vector<8x128xf32>
    %c0_7 = arith.constant 0 : index
    %c0_8 = arith.constant 0 : index
    %15 = vector.load %arg4[%c0_7, %c0_8] : memref<8x128xf32, #tpu.memory_space<vmem>>, vector<8x128xf32>
    tpu.vector_store %arg4[%c0_7, %c0_8], %14 {strides = array<i32>} : memref<8x128xf32, #tpu.memory_space<vmem>>, vector<8x128xf32>,
    return
  }
  func.func @transform_0(%arg0: i32) -> (i32, i32) {
    %c0_i32 = arith.constant 0 : i32
    %c0_i32_0 = arith.constant 0 : i32
    return %arg0, %c0_i32 : i32, i32
  }
  func.func @transform_1(%arg0: i32) -> (i32, i32) {
    %c0_i32 = arith.constant 0 : i32
    %c0_i32_0 = arith.constant 0 : i32
    %c0_i32_1 = arith.constant 0 : i32
    return %c0_i32, %c0_i32_0 : i32, i32
  }
  func.func @transform_2(%arg0: i32) -> (i32, i32) {
    %c0_i32 = arith.constant 0 : i32
    %c0_i32_0 = arith.constant 0 : i32
    %c0_i32_1 = arith.constant 0 : i32
    return %c0_i32, %c0_i32_0 : i32, i32
  }
  func.func @transform_3(%arg0: i32) -> (i32, i32) {
    %c0_i32 = arith.constant 0 : i32
    %c0_i32_0 = arith.constant 0 : i32
    return %arg0, %c0_i32 : i32, i32
  }
}

</mosaic_0001>

<bundles_post_ra>
// kernel: actor_forward.1
= control target key start
LH: loop header
LB: loop body
LE: loop exit
PB: predicated region body
PF: predicated region fallthrough
CT: control target
= control target key end

     0   :  { %s462_s12 = smov 0   ;;  %s586_s0 = inlined_call_operand.vmem [shape: f32[16,256], index: 0, kind: input, shape index: {}]   ;;  %s587_s1 = inlined_call_operand.vmem [shape: f32[256,128], index: 1, kind: input, shape index: {}]   ;;  %s588_s2 = inlined_call_operand.vmem [shape: f32[1,128], index: 2, kind: input, shape index: {}]   ;;  %s589_s3 = inlined_call_operand.vmem [shape: f32[16,128], index: 3, kind: output, shape index: {}]  }
   0x1 LB: > { %s343_s13 = sadd.s32 4294967295, %s440_s12   ;;  %p347_p0 = scmp.ge.s32.totalorder %s440_s12, 1  ;;  %s440_s12 = sphi %s462_s12, %s13_s12  }
   0x2   : > { %p137_p1 = scmp.lt.s32.totalorder %s440_s12, 3 }
   0x4   : > { %p138_p2 = pnand %p347_p0, %p137_p1 }
   0x5   : > { %v187_v0 = vld [vmem:[%s587_s1 + $0x80] sm:$0xff] (!%p138_p2)  ;;  %v188_v1 = vld [vmem:[%s587_s1 + $0x88] sm:$0xff] (!%p138_p2)  ;;  %p160_p3 = scmp.lt.s32.totalorder (!%p138_p2), %s343_s13, 1  ;;  %v189_v5 = vld [vmem:[%s587_s1 + $0x90] sm:$0xff] (!%p138_p2) }
   0x6   : > { %141 = sbr.rel (%p138_p2) target bundleno = 570 (0x23a), region = 32  ;;  %v171_v2 = vld [vmem:[%s587_s1] sm:$0xff] (!%p138_p2)  ;;  %v390_v3 = vpack.c.bf16 (!%p138_p2), %v188_v1, %v187_v0  ;;  %v172_v4 = vld [vmem:[%s587_s1 + $0x8] sm:$0xff] (!%p138_p2)  ;;  %v190_v6 = vld [vmem:[%s587_s1 + $0x98] sm:$0xff] (!%p138_p2) }
   0x7   : > { %v392_v7 = vpack.c.bf16 (!%p138_p2), %v172_v4, %v171_v2  ;;  %v394_v8 = vpack.c.bf16 (!%p138_p2), %v190_v6, %v189_v5  ;;  %v173_v9 = vld [vmem:[%s587_s1 + $0x10] sm:$0xff] (!%p138_p2)  ;;  %v174_v10 = vld [vmem:[%s587_s1 + $0x18] sm:$0xff] (!%p138_p2)  ;;  %v191_v11 = vld [vmem:[%s587_s1 + $0xa0] sm:$0xff] (!%p138_p2) }
   0x8   : > { %391 = vmatprep.subr.bf16.mxu0 (!%p138_p2), %v390_v3  ;;  %v192_v12 = vld [vmem:[%s587_s1 + $0xa8] sm:$0xff] (!%p138_p2)  ;;  %v396_v13 = vpack.c.bf16 (!%p138_p2), %v174_v10, %v173_v9  ;;  %v175_v15 = vld [vmem:[%s587_s1 + $0x20] sm:$0xff] (!%p138_p2)  ;;  %v193_v17 = vld [vmem:[%s587_s1 + $0xb0] sm:$0xff] (!%p138_p2) }
   0x9   : > { %393 = vmatpush3.bf16.msra.mxu0 (!%p138_p2), %v392_v7  ;;  %v398_v14 = vpack.c.bf16 (!%p138_p2), %v192_v12, %v191_v11  ;;  %v176_v16 = vld [vmem:[%s587_s1 + $0x28] sm:$0xff] (!%p138_p2)  ;;  %v194_v18 = vld [vmem:[%s587_s1 + $0xb8] sm:$0xff] (!%p138_p2)  ;;  %v177_v21 = vld [vmem:[%s587_s1 + $0x30] sm:$0xff] (!%p138_p2) }
   0xa   : > { %395 = vmatprep.subr.bf16.mxu0 (!%p138_p2), %v394_v8  ;;  %v400_v19 = vpack.c.bf16 (!%p138_p2), %v176_v16, %v175_v15  ;;  %v402_v20 = vpack.c.bf16 (!%p138_p2), %v194_v18, %v193_v17  ;;  %v178_v22 = vld [vmem:[%s587_s1 + $0x38] sm:$0xff] (!%p138_p2)  ;;  %v195_v23 = vld [vmem:[%s587_s1 + $0xc0] sm:$0xff] (!%p138_p2)  ;;  %v196_v24 = vld [vmem:[%s587_s1 + $0xc8] sm:$0xff] (!%p138_p2) }
   0xb   : > { %v404_v26 = vpack.c.bf16 (!%p138_p2), %v178_v22, %v177_v21  ;;  %v406_v27 = vpack.c.bf16 (!%p138_p2), %v196_v24, %v195_v23  ;;  %v179_v28 = vld [vmem:[%s587_s1 + $0x40] sm:$0xff] (!%p138_p2)  ;;  %v180_v29 = vld [vmem:[%s587_s1 + $0x48] sm:$0xff] (!%p138_p2)  ;;  %v197_v30 = vld [vmem:[%s587_s1 + $0xd0] sm:$0xff] (!%p138_p2) }
   0xc   : > { %v198_v31 = vld [vmem:[%s587_s1 + $0xd8] sm:$0xff] (!%p138_p2)  ;;  %v408_v32 = vpack.c.bf16 (!%p138_p2), %v180_v29, %v179_v28  ;;  %v181_v34 = vld [vmem:[%s587_s1 + $0x50] sm:$0xff] (!%p138_p2)  ;;  %v199_v36 = vld [vmem:[%s587_s1 + $0xe0] sm:$0xff] (!%p138_p2) }
   0xd   : > { %s591_s13 = smov (!%p160_p3, %s343_s13), 1  ;;  %397 = vmatpush3.bf16.msra.mxu0 %v396_v13  ;;  %v410_v33 = vpack.c.bf16 %v198_v31, %v197_v30  ;;  %v182_v35 = vld [vmem:[%s587_s1 + $0x58] sm:$0xff]  ;;  %v200_v37 = vld [vmem:[%s587_s1 + $0xe8] sm:$0xff]  ;;  %v183_v40 = vld [vmem:[%s587_s1 + $0x60] sm:$0xff] }
   0xe   : > { %s354_s7 = sshll.u32 %s591_s13, 4  ;;  %399 = vmatprep.subr.bf16.mxu0 %v398_v14  ;;  %v412_v38 = vpack.c.bf16 %v182_v35, %v181_v34  ;;  %v414_v39 = vpack.c.bf16 %v200_v37, %v199_v36  ;;  %v184_v41 = vld [vmem:[%s587_s1 + $0x68] sm:$0xff]  ;;  %v201_v42 = vld [vmem:[%s587_s1 + $0xf0] sm:$0xff]  ;;  %v202_v43 = vld [vmem:[%s587_s1 + $0xf8] sm:$0xff] }
   0xf   : > { %s518_s20 = scalar_lea.vmem %s586_s0, %s354_s7  ;;  %v416_v44 = vpack.c.bf16 %v184_v41, %v183_v40  ;;  %v418_v45 = vpack.c.bf16 %v202_v43, %v201_v42  ;;  %v185_v46 = vld [vmem:[%s587_s1 + $0x70] sm:$0xff]  ;;  %v186_v47 = vld [vmem:[%s587_s1 + $0x78] sm:$0xff]  ;;  %v351_v52 = vld [vmem:[%s588_s2] ss:$0 sm:$0xff] }
  0x10   : > { %v170_v25 = vld [vmem:[%s518_s20 + $0x8] sm:$0xff]  ;;  %v420_v48 = vpack.c.bf16 %v186_v47, %v185_v46  ;;  %v169_v49 = vld [vmem:[%s518_s20] sm:$0xff]  ;;  %s350_s20 = sshll.u32 %s591_s13, 3 }
  0x11   : > { %274 = vmatprep.mubr.f32.mxu0 %v170_v25  ;;  %401 = vmatpush3.bf16.msra.mxu0 %v400_v19  ;;  %s168_s10 = scalar_lea.vmem %s589_s3, %s350_s20 }
  0x12   : > { %403 = vmatprep.subr.bf16.mxu0 %v402_v20 }
  0x15   : > { %405 = vmatpush3.bf16.msra.mxu0 %v404_v26 }
  0x16   : > { %407 = vmatprep.subr.bf16.mxu0 %v406_v27 }
  0x19   : > { %409 = vmatpush3.bf16.msra.mxu0 %v408_v32 }
  0x1a   : > { %411 = vmatprep.subr.bf16.mxu0 %v410_v33 }
  0x1d   : > { %413 = vmatpush3.bf16.msra.mxu0 %v412_v38 }
  0x1e   : > { %415 = vmatprep.subr.bf16.mxu0 %v414_v39 }
  0x21   : > { %417 = vmatpush3.bf16.msra.mxu0 %v416_v44 }
  0x22   : > { %419 = vmatprep.subr.bf16.mxu0 %v418_v45 }
  0x25   : > { %421 = vmatpush3.bf16.msra.mxu0 %v420_v48 }
  0x28   : > { %275 = vmatmul.mubr.f32.vlgmr.msra.gmra.mrb[0].mxu0 %v169_v49 }
  0xfb   : > { %v387_v50 = vpop.f32.mrb[0].mxu0 }
  0xfc   : > { %v388_v51 = vpop.f32.mrb[1].mxu0 }
  0xfd   : > { %v389_v53 = vadd.f32 %v388_v51, %v387_v50 }
  0xff   : > { %v277_v54 = vadd.f32 %v389_v53, %v351_v52 }
 0x101   : > { %280 = vmax.xlane.f32.xlu0 %v277_v54 }
 0x18e   : > { %v281_v55 = vpop.xlane.xlu0 %280 }
 0x18f   : > { %v282_v56 = vsub.f32 %v277_v54, %v281_v55 }
 0x191   : > { %v283_v57 = vmul.f32 1.442695, %v282_v56 }
 0x193   : > { %430 = vpow2.f32 %v283_v57 }
 0x19d   : > { %v431_v58 = vpop.eup %430 }
 0x19e   : > { %285 = vadd.xlane.f32.xlu0 %v431_v58 }
 0x22b   : > { %v286_v59 = vpop.xlane.xlu0 %285 }
 0x22c   : > { %432 = vrcp.f32 %v286_v59 }
 0x236   : > { %v433_v60 = vpop.eup %432 }
 0x237   : > { %v288_v61 = vmul.f32 %v433_v60, %v431_v58 }
 0x239   : > { %289 = vst [vmem:[%s168_s10] sm:$0xff] %v288_v61 }
 0x23a PF: > { %s13_s12 = sadd.s32 1, %s440_s12  }
 0x23b   : > { %p10_p4 = scmp.ge.s32.totalorder %s13_s12, 4  }
 0x23d   :  { %12 = sbr.rel (!%p10_p4) target bundleno = 1 (0x1), region = 62 }

</bundles_post_ra>
